<compile_context>
chip_gen: v7x
topology: tpu7x:2x2x1
jax: 0.10.0
libtpu: 0.0.40
codegen_flags: <defaults>
</compile_context>

<pallas_src>
import functools

import jax
import jax.numpy as jnp
from jax.experimental import pallas as pl
from jax.experimental.pallas import tpu as pltpu


def _round_up(n, m):
    return ((n + m - 1) // m) * m


def _vmem_capacity_bytes():
    """Queried VMEM capacity with a conservative fallback (v7x per-TC)."""
    try:
        info = pltpu.get_tpu_info()
        cap = getattr(info, "vmem_capacity_bytes", None)
        if cap:
            return int(cap)
    except Exception:
        pass
    return 64 << 20


def _pick_tiles(Bp, Lf, DF, itemsize, x_budget_bytes):
    """Pick (TB, TL) so the double-buffered x tile fits the VMEM budget.

    Bp: batch (padded to a multiple of 8); Lf: folded sequence length;
    DF: folded feature width (lane-dense when possible)."""
    # --- batch tile: multiple of 8, dividing Bp -----------------------------
    TB = min(Bp, 256)
    if Bp >= 16:
        # at least 2 blocks on the "parallel" axis so both v7x TCs get work
        TB = min(TB, max(8, (Bp // 2) // 8 * 8))
    TB = max(8, (TB // 8) * 8)
    while Bp % TB:
        TB -= 8

    # --- sequence tile: multiple of 8 (or full Lf), lane-padded byte math ---
    if Lf <= 8:
        return TB, Lf
    DF_pad = _round_up(DF, 128)            # VMEM stores the minor dim lane-padded
    bytes_per_row = TB * DF_pad * itemsize
    cap = max(8, (x_budget_bytes // (2 * bytes_per_row)) // 8 * 8)
    TL = int(min((Lf // 8) * 8, cap))
    # prefer a TL that divides Lf (skips the masked tail step) if one exists
    # without shrinking the tile by more than ~2x
    if Lf % TL:
        for t in range(TL, max(7, TL // 2 - 1), -8):
            if Lf % t == 0:
                TL = t
                break
    return TB, TL


def decode_kernel(x_ref, w1_ref, b1_ref, w2_ref, b2_ref, out_ref, pool_ref,
                  *, Lf, TL, D, F, mask_seq):
    """x_ref:   (TB, TL, DF)  streamed activations (DF = F*D, lane-dense fold)
       w1_ref:  (D, D4P) f32   b1_ref: (1, D4P) f32
       w2_ref:  (D4P, GP) f32  b2_ref: (1, GP)  f32
       out_ref: (TB, GP)
       pool_ref:(TB, DF) running-max scratch, persists across the L axis."""
    l_idx = pl.program_id(1)
    n_l = pl.num_programs(1)

    # --- init the running max at the first sequence chunk -------------------
    @pl.when(l_idx == 0)
    def _():
        pool_ref[...] = jnp.full_like(pool_ref, -jnp.inf)

    # --- streamed max over this sequence chunk ------------------------------
    x = x_ref[...]                                            # keep input dtype
    if mask_seq:
        # only the final chunk can contain padded positions -> keep the
        # steady-state loop as pure vld + vmax.
        @pl.when(l_idx < n_l - 1)
        def _():
            pool_ref[...] = jnp.maximum(pool_ref[...], jnp.max(x, axis=1))

        @pl.when(l_idx == n_l - 1)
        def _():
            pos = l_idx * TL + jax.lax.broadcasted_iota(jnp.int32, x.shape, 1)
            neg = jnp.array(-jnp.inf, dtype=x.dtype)
            xm = jnp.where(pos < Lf, x, neg)
            pool_ref[...] = jnp.maximum(pool_ref[...], jnp.max(xm, axis=1))
    else:
        pool_ref[...] = jnp.maximum(pool_ref[...], jnp.max(x, axis=1))

    # --- epilogue: group-max + MLP head, last L step only --------------------
    @pl.when(l_idx == n_l - 1)
    def _():
        p = pool_ref[...].astype(jnp.float32)                 # (TB, DF)
        pooled = p[:, :D]
        for g in range(1, F):                                 # intra-lane group-max
            pooled = jnp.maximum(pooled, p[:, g * D:(g + 1) * D])
        h = jnp.dot(pooled, w1_ref[...],
                    preferred_element_type=jnp.float32) + b1_ref[...]
        h = jnp.maximum(h, 0.0)                               # ReLU
        o = jnp.dot(h, w2_ref[...],
                    preferred_element_type=jnp.float32) + b2_ref[...]
        out_ref[...] = o.astype(out_ref.dtype)                # lane-dense vst


def prepare_params(w1, b1, w2, b2):
    """Pad the tiny hidden/label dims to 128 lanes ONCE (hoisted out of the
    per-call path).  Zero padding is exact: padded hidden columns are
    relu(0)=0 and multiply zero rows of w2."""
    D, D4 = w1.shape
    G = w2.shape[1]
    D4P = _round_up(D4, 128)
    GP = _round_up(G, 128)
    w1_p = jnp.zeros((D, D4P), jnp.float32).at[:, :D4].set(w1.astype(jnp.float32))
    b1_p = jnp.zeros((1, D4P), jnp.float32).at[:, :D4].set(b1.astype(jnp.float32))
    w2_p = jnp.zeros((D4P, GP), jnp.float32).at[:D4, :G].set(w2.astype(jnp.float32))
    b2_p = jnp.zeros((1, GP), jnp.float32).at[:, :G].set(b2.astype(jnp.float32))
    return (w1_p, b1_p, w2_p, b2_p), G


def decode_forward(x, padded_params, num_labels):
    """x: (B, L, D) float.  padded_params from prepare_params().
    Returns (B, num_labels) float32 — matches PyTorch `decode.forward`."""
    w1_p, b1_p, w2_p, b2_p = padded_params
    B, L, D = x.shape
    D4P = w1_p.shape[1]
    GP = w2_p.shape[1]

    if not jnp.issubdtype(x.dtype, jnp.floating):
        x = x.astype(jnp.float32)

    # --- lane-dense fold: (B, L, D) -> (B, L//F, F*D) (free reshape) ---------
    if D < 128 and 128 % D == 0 and L % (128 // D) == 0:
        fold = 128 // D
    else:
        fold = 1
    Lf = L // fold
    DF = fold * D
    xf = x.reshape(B, Lf, DF)

    # --- batch padded to a multiple of 8 (sublane-aligned tiles) ------------
    Bp = _round_up(B, 8)
    if Bp != B:
        xf = jnp.pad(xf, ((0, Bp - B), (0, 0), (0, 0)))

    # --- per-chip VMEM budget ------------------------------------------------
    cap = _vmem_capacity_bytes()
    vmem_limit = min((cap * 3) // 4, 100 << 20)     # ~96 MiB on v5e/v6e, 48 MiB on v7x
    x_budget = min((cap * 3) // 8, 48 << 20)        # double-buffered x tile budget

    TB, TL = _pick_tiles(Bp, Lf, DF, xf.dtype.itemsize, x_budget)
    grid = (Bp // TB, pl.cdiv(Lf, TL))
    mask_seq = (Lf % TL) != 0

    pool_dtype = xf.dtype                           # bf16 max is exact; keeps vregs packed

    kernel = functools.partial(decode_kernel, Lf=Lf, TL=TL, D=D, F=fold,
                               mask_seq=mask_seq)

    out_p = pl.pallas_call(
        kernel,
        out_shape=jax.ShapeDtypeStruct((Bp, GP), jnp.float32),
        grid=grid,
        in_specs=[
            pl.BlockSpec((TB, TL, DF), lambda i, k: (i, k, 0)),   # streamed x
            pl.BlockSpec((D, D4P), lambda i, k: (0, 0)),          # resident w1
            pl.BlockSpec((1, D4P), lambda i, k: (0, 0)),          # resident b1
            pl.BlockSpec((D4P, GP), lambda i, k: (0, 0)),         # resident w2
            pl.BlockSpec((1, GP), lambda i, k: (0, 0)),           # resident b2
        ],
        out_specs=pl.BlockSpec((TB, GP), lambda i, k: (i, 0)),
        scratch_shapes=[pltpu.VMEM((TB, DF), pool_dtype)],        # running max
        compiler_params=pltpu.CompilerParams(
            dimension_semantics=("parallel", "arbitrary"),
            vmem_limit_bytes=int(vmem_limit),
        ),
    )(xf, w1_p, b1_p, w2_p, b2_p)

    return out_p[:B, :num_labels]


def reference_forward(x, w1, b1, w2, b2):
    pooled = jnp.max(x, axis=1)
    h = jnp.maximum(pooled @ w1 + b1, 0.0)
    return h @ w2 + b2


if __name__ == "__main__":
    # config: mlp_rel_size = 32 -> hidden = 32 // 4 = 8; get_label = 4
    B, L, D = 2, 8, 32
    D4 = D // 4
    G = 4

    key = jax.random.PRNGKey(0)
    kx, kw1, kb1, kw2, kb2 = jax.random.split(key, 5)

    x = jax.random.normal(kx, (B, L, D), dtype=jnp.float32)
    # "nn.Linear"-style parameters stored as (in, out), so y = x @ W + b.
    w1 = jax.random.uniform(kw1, (D, D4), minval=-1.0, maxval=1.0,
                            dtype=jnp.float32) / jnp.sqrt(D)
    b1 = jax.random.uniform(kb1, (D4,), minval=-1.0, maxval=1.0,
                            dtype=jnp.float32) / jnp.sqrt(D)
    w2 = jax.random.uniform(kw2, (D4, G), minval=-1.0, maxval=1.0,
                            dtype=jnp.float32) / jnp.sqrt(D4)
    b2 = jax.random.uniform(kb2, (G,), minval=-1.0, maxval=1.0,
                            dtype=jnp.float32) / jnp.sqrt(D4)

    padded_params, num_labels = prepare_params(w1, b1, w2, b2)  # hoisted (one-time)

    out = decode_forward(x, padded_params, num_labels)
    out = jax.block_until_ready(out)

    ref = reference_forward(x, w1, b1, w2, b2)
    assert out.shape == (B, G)
    assert jnp.allclose(out, ref, atol=1e-5, rtol=1e-5), "mismatch vs reference"

    print("KERNEL_OK")
</pallas_src>

<mosaic_0001>
module attributes {stable_mosaic.version = 11 : i64} {
  func.func @decode_kernel(%arg0: i32, %arg1: i32, %arg2: memref<8x2x128xf32, #tpu.memory_space<vmem>>, %arg3: memref<32x128xf32, #tpu.memory_space<vmem>>, %arg4: memref<1x128xf32, #tpu.memory_space<vmem>>, %arg5: memref<128x128xf32, #tpu.memory_space<vmem>>, %arg6: memref<1x128xf32, #tpu.memory_space<vmem>>, %arg7: memref<8x128xf32, #tpu.memory_space<vmem>>, %arg8: memref<8x128xf32, #tpu.memory_space<vmem>>) attributes {dimension_semantics = [#tpu.dimension_semantics<parallel>, #tpu.dimension_semantics<arbitrary>], iteration_bounds = array<i64: 1, 1>, scalar_prefetch = 0 : i64, scratch_operands = 1 : i64, tpu.core_type = #tpu.core_type<tc>, window_params = [{transform_indices = @transform_0, window_bounds = array<i64: 8, 2, 128>}, {pipeline_mode = #tpu.pipeline_mode<synchronous>, transform_indices = @transform_1, window_bounds = array<i64: 32, 128>}, {pipeline_mode = #tpu.pipeline_mode<synchronous>, transform_indices = @transform_2, window_bounds = array<i64: 1, 128>}, {pipeline_mode = #tpu.pipeline_mode<synchronous>, transform_indices = @transform_3, window_bounds = array<i64: 128, 128>}, {pipeline_mode = #tpu.pipeline_mode<synchronous>, transform_indices = @transform_4, window_bounds = array<i64: 1, 128>}, {transform_indices = @transform_5, window_bounds = array<i64: 8, 128>}]} {
    %c0_i32 = arith.constant 0 : i32
    %0 = arith.cmpi eq, %arg1, %c0_i32 : i32
    %1 = arith.extui %0 : i1 to i32
    %c0_i32_0 = arith.constant 0 : i32
    %2 = arith.cmpi ne, %1, %c0_i32_0 : i32
    scf.if %2 {
      %cst_9 = arith.constant 0xFF800000 : f32
      %11 = vector.broadcast %cst_9 : f32 to vector<8x128xf32>
      %c0_10 = arith.constant 0 : index
      %c0_11 = arith.constant 0 : index
      %12 = vector.load %arg8[%c0_10, %c0_11] : memref<8x128xf32, #tpu.memory_space<vmem>>, vector<8x128xf32>
      tpu.vector_store %arg8[%c0_10, %c0_11], %11 {strides = array<i32>} : memref<8x128xf32, #tpu.memory_space<vmem>>, vector<8x128xf32>,
    } else {
    }
    %c0 = arith.constant 0 : index
    %c0_1 = arith.constant 0 : index
    %c0_2 = arith.constant 0 : index
    %3 = vector.load %arg2[%c0, %c0_1, %c0_2] : memref<8x2x128xf32, #tpu.memory_space<vmem>>, vector<8x2x128xf32>
    %c0_3 = arith.constant 0 : index
    %c0_4 = arith.constant 0 : index
    %4 = vector.load %arg8[%c0_3, %c0_4] : memref<8x128xf32, #tpu.memory_space<vmem>>, vector<8x128xf32>
    %cst = arith.constant dense<0xFF800000> : vector<8x128xf32>
    %5 = vector.multi_reduction <maximumf>, %3, %cst [1] : vector<8x2x128xf32> to vector<8x128xf32>
    %6 = arith.maximumf %4, %5 : vector<8x128xf32>
    %c0_5 = arith.constant 0 : index
    %c0_6 = arith.constant 0 : index
    %7 = vector.load %arg8[%c0_5, %c0_6] : memref<8x128xf32, #tpu.memory_space<vmem>>, vector<8x128xf32>
    tpu.vector_store %arg8[%c0_5, %c0_6], %6 {strides = array<i32>} : memref<8x128xf32, #tpu.memory_space<vmem>>, vector<8x128xf32>,
    %c0_i32_7 = arith.constant 0 : i32
    %8 = arith.cmpi eq, %arg1, %c0_i32_7 : i32
    %9 = arith.extui %8 : i1 to i32
    %c0_i32_8 = arith.constant 0 : i32
    %10 = arith.cmpi ne, %9, %c0_i32_8 : i32
    scf.if %10 {
      %c0_9 = arith.constant 0 : index
      %c0_10 = arith.constant 0 : index
      %11 = vector.load %arg8[%c0_9, %c0_10] : memref<8x128xf32, #tpu.memory_space<vmem>>, vector<8x128xf32>
      %12 = vector.extract_strided_slice %11 {offsets = [0, 0], sizes = [8, 32], strides = [1, 1]} : vector<8x128xf32> to vector<8x32xf32>
      %13 = vector.extract_strided_slice %11 {offsets = [0, 32], sizes = [8, 32], strides = [1, 1]} : vector<8x128xf32> to vector<8x32xf32>
      %14 = arith.maximumf %12, %13 : vector<8x32xf32>
      %15 = vector.extract_strided_slice %11 {offsets = [0, 64], sizes = [8, 32], strides = [1, 1]} : vector<8x128xf32> to vector<8x32xf32>
      %16 = arith.maximumf %14, %15 : vector<8x32xf32>
      %17 = vector.extract_strided_slice %11 {offsets = [0, 96], sizes = [8, 32], strides = [1, 1]} : vector<8x128xf32> to vector<8x32xf32>
      %18 = arith.maximumf %16, %17 : vector<8x32xf32>
      %c0_11 = arith.constant 0 : index
      %c0_12 = arith.constant 0 : index
      %19 = vector.load %arg3[%c0_11, %c0_12] : memref<32x128xf32, #tpu.memory_space<vmem>>, vector<32x128xf32>
      %cst_13 = arith.constant dense<0.000000e+00> : vector<8x128xf32>
      %20 = tpu.matmul %18, %19, %cst_13 {dimension_numbers = #tpu.dot_dimension_numbers<[1], [0], [0], [1], [0, 0, 1, 1], [], []>} : vector<8x32xf32>, vector<32x128xf32>, vector<8x128xf32> -> vector<8x128xf32>
      %c0_14 = arith.constant 0 : index
      %c0_15 = arith.constant 0 : index
      %21 = vector.load %arg4[%c0_14, %c0_15] : memref<1x128xf32, #tpu.memory_space<vmem>>, vector<1x128xf32>
      %22 = vector.broadcast %21 : vector<1x128xf32> to vector<8x128xf32>
      %23 = arith.addf %20, %22 : vector<8x128xf32>
      %cst_16 = arith.constant 0.000000e+00 : f32
      %24 = vector.broadcast %cst_16 : f32 to vector<8x128xf32>
      %25 = arith.maximumf %23, %24 : vector<8x128xf32>
      %c0_17 = arith.constant 0 : index
      %c0_18 = arith.constant 0 : index
      %26 = vector.load %arg5[%c0_17, %c0_18] : memref<128x128xf32, #tpu.memory_space<vmem>>, vector<128x128xf32>
      %cst_19 = arith.constant dense<0.000000e+00> : vector<8x128xf32>
      %27 = tpu.matmul %25, %26, %cst_19 {dimension_numbers = #tpu.dot_dimension_numbers<[1], [0], [0], [1], [0, 0, 1, 1], [], []>} : vector<8x128xf32>, vector<128x128xf32>, vector<8x128xf32> -> vector<8x128xf32>
      %c0_20 = arith.constant 0 : index
      %c0_21 = arith.constant 0 : index
      %28 = vector.load %arg6[%c0_20, %c0_21] : memref<1x128xf32, #tpu.memory_space<vmem>>, vector<1x128xf32>
      %29 = vector.broadcast %28 : vector<1x128xf32> to vector<8x128xf32>
      %30 = arith.addf %27, %29 : vector<8x128xf32>
      %c0_22 = arith.constant 0 : index
      %c0_23 = arith.constant 0 : index
      %31 = vector.load %arg7[%c0_22, %c0_23] : memref<8x128xf32, #tpu.memory_space<vmem>>, vector<8x128xf32>
      tpu.vector_store %arg7[%c0_22, %c0_23], %30 {strides = array<i32>} : memref<8x128xf32, #tpu.memory_space<vmem>>, vector<8x128xf32>,
    } else {
    }
    return
  }
  func.func @transform_0(%arg0: i32, %arg1: i32) -> (i32, i32, i32) {
    %c0_i32 = arith.constant 0 : i32
    %c0_i32_0 = arith.constant 0 : i32
    return %arg0, %arg1, %c0_i32 : i32, i32, i32
  }
  func.func @transform_1(%arg0: i32, %arg1: i32) -> (i32, i32) {
    %c0_i32 = arith.constant 0 : i32
    %c0_i32_0 = arith.constant 0 : i32
    %c0_i32_1 = arith.constant 0 : i32
    return %c0_i32, %c0_i32_0 : i32, i32
  }
  func.func @transform_2(%arg0: i32, %arg1: i32) -> (i32, i32) {
    %c0_i32 = arith.constant 0 : i32
    %c0_i32_0 = arith.constant 0 : i32
    %c0_i32_1 = arith.constant 0 : i32
    return %c0_i32, %c0_i32_0 : i32, i32
  }
  func.func @transform_3(%arg0: i32, %arg1: i32) -> (i32, i32) {
    %c0_i32 = arith.constant 0 : i32
    %c0_i32_0 = arith.constant 0 : i32
    %c0_i32_1 = arith.constant 0 : i32
    return %c0_i32, %c0_i32_0 : i32, i32
  }
  func.func @transform_4(%arg0: i32, %arg1: i32) -> (i32, i32) {
    %c0_i32 = arith.constant 0 : i32
    %c0_i32_0 = arith.constant 0 : i32
    %c0_i32_1 = arith.constant 0 : i32
    return %c0_i32, %c0_i32_0 : i32, i32
  }
  func.func @transform_5(%arg0: i32, %arg1: i32) -> (i32, i32) {
    %c0_i32 = arith.constant 0 : i32
    %c0_i32_0 = arith.constant 0 : i32
    return %arg0, %c0_i32 : i32, i32
  }
}

</mosaic_0001>

<bundles_post_ra>
// kernel: tpu_custom_call.1
= control target key start
LH: loop header
LB: loop body
LE: loop exit
PB: predicated region body
PF: predicated region fallthrough
CT: control target
= control target key end

     0   :  { %10 = vsyncpa [#allocation4], 0  ;;  %s699_s0 = inlined_call_operand.hbm [shape: f32[8,2,128], index: 0, kind: input, shape index: {}]   ;;  %s700_s1 = inlined_call_operand.hbm [shape: f32[32,128], index: 1, kind: input, shape index: {}]   ;;  %s701_s2 = inlined_call_operand.vmem [shape: f32[1,128], index: 2, kind: input, shape index: {}]   ;;  %s702_s3 = inlined_call_operand.hbm [shape: f32[128,128], index: 3, kind: input, shape index: {}]   ;;  %s703_s4 = inlined_call_operand.vmem [shape: f32[1,128], index: 4, kind: input, shape index: {}]   ;;  %s704_s5 = inlined_call_operand.hbm [shape: f32[8,128], index: 5, kind: output, shape index: {}]  }
   0x1   :  { %11 = vsyncpa [#allocation7], 0 }
   0x2   :  { %12 = vsyncpa [#allocation5], 0  ;;  %s579_s18 = smov [#allocation6]   ;;  %s485_s22 = scalar_lea.hbm %s700_s1, 512 }
   0x3   :  { %s30_s19 = sshll.u32 %s579_s18, 4  ;;  %p486_p0 = scmp.ne.s32.totalorder %s700_s1, %s485_s22  ;;  %s31_s19 = int_to_ptr.vmem [resolvable:$true] %s30_s19 }
   0x4   :  { %p489_p1 = scmp.lt.u32.totalorder %s485_s22, %s700_s1 }
   0x6   :  { %p491_p2 = pnand %p489_p1, %p486_p0 }
   0x8   :  { %494 = shalt.err (!%p491_p2)
}
   0x9   :  { %s495_s27 = scalar_lea.vmem %s31_s19, 512  ;;  %p500_p4 = scmp.lt.s32.totalorder %s31_s19, %s31_s19 }
   0xa   :  { %p496_p3 = scmp.ne.s32.totalorder %s31_s19, %s495_s27  ;;  %p501_p5 = scmp.lt.s32.totalorder %s495_s27, %s495_s27 }
   0xc   :  { %p502_p6 = por %p501_p5, %p500_p4 }
   0xe   :  { %p503_p7 = pnand %p502_p6, %p496_p3 }
  0x10   :  { %506 = shalt.err (!%p503_p7)
}
  0x11   :  { %s580_s28 = smov 128   ;;  %s581_s29 = smov 8  }
  0x12   :  { %36 = dma.hbm_to_vmem [thread:$0]  %s700_s1, 512, %s31_s19, [#allocation7], %s580_s28, %s580_s28, %s581_s29  }
  0x13   :  { %s582_s7 = smov [#allocation3]   ;;  %s507_s11 = scalar_lea.hbm %s699_s0, 256 }
  0x14   :  { %s18_s8 = sshll.u32 %s582_s7, 4  ;;  %p508_p8 = scmp.ne.s32.totalorder %s699_s0, %s507_s11  ;;  %s19_s8 = int_to_ptr.vmem [resolvable:$true] %s18_s8 }
  0x15   :  { %p511_p9 = scmp.lt.u32.totalorder %s507_s11, %s699_s0 }
  0x17   :  { %p513_p10 = pnand %p511_p9, %p508_p8 }
  0x19   :  { %516 = shalt.err (!%p513_p10)
}
  0x1a   :  { %s517_s16 = scalar_lea.vmem %s19_s8, 256  ;;  %p522_p12 = scmp.lt.s32.totalorder %s19_s8, %s19_s8 }
  0x1b   :  { %p518_p11 = scmp.ne.s32.totalorder %s19_s8, %s517_s16  ;;  %p523_p13 = scmp.lt.s32.totalorder %s517_s16, %s517_s16 }
  0x1d   :  { %p524_p0 = por %p523_p13, %p522_p12 }
  0x1f   :  { %p525_p1 = pnand %p524_p0, %p518_p11 }
  0x21   :  { %528 = shalt.err (!%p525_p1)
}
  0x22   :  { %s583_s1 = smov 32   ;;  %s584_s17 = smov 2  }
  0x23   :  { %24 = dma.hbm_to_vmem [thread:$0]  %s699_s0, 256, %s19_s8, [#allocation4], %s583_s1, %s583_s1, %s584_s17  }
  0x24   :  { %s585_s20 = smov [#allocation8]   ;;  %s529_s24 = scalar_lea.hbm %s702_s3, 2048 }
  0x25   :  { %s44_s21 = sshll.u32 %s585_s20, 4  ;;  %p530_p2 = scmp.ne.s32.totalorder %s702_s3, %s529_s24  ;;  %s45_s21 = int_to_ptr.vmem [resolvable:$true] %s44_s21 }
  0x26   :  { %p533_p3 = scmp.lt.u32.totalorder %s529_s24, %s702_s3 }
  0x28   :  { %p535_p4 = pnand %p533_p3, %p530_p2 }
  0x2a   :  { %538 = shalt.err (!%p535_p4)
}
  0x2b   :  { %s539_s6 = scalar_lea.vmem %s45_s21, 2048  ;;  %p544_p6 = scmp.lt.s32.totalorder %s45_s21, %s45_s21 }
  0x2c   :  { %p540_p5 = scmp.ne.s32.totalorder %s45_s21, %s539_s6  ;;  %p545_p7 = scmp.lt.s32.totalorder %s539_s6, %s539_s6 }
  0x2e   :  { %p546_p8 = por %p545_p7, %p544_p6 }
  0x30   :  { %p547_p9 = pnand %p546_p8, %p540_p5 }
  0x32   :  { %550 = shalt.err (!%p547_p9)
}
  0x33   :  { %50 = dma.hbm_to_vmem [thread:$0]  %s702_s3, 2048, %s45_s21, [#allocation7], %s580_s28, %s580_s28, %s581_s29  }
  0x34   :  { %573 = dma.done.wait [#allocation4], 256  }
  0x35   :  { %574 = vsyncadd [#allocation4], 4294967040 }
  0x36   :  { %575 = dma.done.wait [#allocation7], 2560  }
  0x37   :  { %576 = vsyncadd [#allocation7], 4294964736  ;;  %vm76_vm0 = vcmask 1041408   ;;  %v67_v0 = vld [vmem:[#allocation3] sm:$0x3]  ;;  %vm141_vm1 = vcmask 1041409  }
  0x38   :  { %v68_v1 = vld [vmem:[#allocation3 + $0x2] sm:$0x3]  ;;  %v69_v2 = vld [vmem:[#allocation3 + $0x4] sm:$0x3]  ;;  %v70_v3 = vld [vmem:[#allocation3 + $0x6] sm:$0x3] }
  0x39   :  { %v71_v4 = vld [vmem:[#allocation3 + $0x8] sm:$0x3]  ;;  %v72_v5 = vld [vmem:[#allocation3 + $0xa] sm:$0x3]  ;;  %v73_v6 = vld [vmem:[#allocation3 + $0xc] sm:$0x3] }
  0x3a   :  { %v77_v7 = vsel %vm76_vm0, %v67_v0, -inf  ;;  %v84_v8 = vsel %vm76_vm0, %v68_v1, -inf  ;;  %v74_v9 = vld [vmem:[#allocation3 + $0xe] sm:$0x3]  ;;  %v91_v12 = vsel %vm76_vm0, %v69_v2, -inf  ;;  %v98_v13 = vsel %vm76_vm0, %v70_v3, -inf }
  0x3b   :  { %v78_v10 = vrot.slane %v77_v7, 4  ;;  %v85_v11 = vrot.slane %v84_v8, 4  ;;  %v92_v14 = vrot.slane %v91_v12, 4  ;;  %v99_v15 = vrot.slane %v98_v13, 4  ;;  %v175_v54 = vld [vmem:[#allocation6] sm:$0xff]  ;;  %v176_v55 = vld [vmem:[#allocation6 + $0x8] sm:$0xff] }
  0x3c   :  { %v105_v16 = vsel %vm76_vm0, %v71_v4, -inf  ;;  %v112_v17 = vsel %vm76_vm0, %v72_v5, -inf  ;;  %vm143_vm2 = vcmask 1042434   ;;  %v119_v24 = vsel %vm76_vm0, %v73_v6, -inf  ;;  %v177_v4 = vld [vmem:[#allocation6 + $0x10] sm:$0xff]  ;;  %v178_v5 = vld [vmem:[#allocation6 + $0x18] sm:$0xff] }
  0x3d   :  { %v79_v18 = vmax.f32 %v77_v7, %v78_v10  ;;  %v86_v19 = vmax.f32 %v84_v8, %v85_v11  ;;  %v106_v20 = vrot.slane %v105_v16, 4  ;;  %v113_v21 = vrot.slane %v112_v17, 4  ;;  %v261_v7 = vld [vmem:[#allocation8] sm:$0xff]  ;;  %v262_v8 = vld [vmem:[#allocation8 + $0x8] sm:$0xff]  ;;  %s589_s3 = smov 96   ;;  %s590_s28 = smov 64  }
  0x3e   :  { %v93_v22 = vmax.f32 %v91_v12, %v92_v14  ;;  %v100_v23 = vmax.f32 %v98_v13, %v99_v15  ;;  %v126_v25 = vsel %vm76_vm0, %v74_v9, -inf  ;;  %vm145_vm3 = vcmask 1043459   ;;  %v263_v13 = vld [vmem:[#allocation8 + $0x10] sm:$0xff]  ;;  %v264_v14 = vld [vmem:[#allocation8 + $0x18] sm:$0xff]  ;;  %s591_s11 = smov [#allocation9]  }
  0x3f   :  { %v80_v26 = vrot.slane %v79_v18, 2  ;;  %v87_v27 = vrot.slane %v86_v19, 2  ;;  %v107_v28 = vmax.f32 %v105_v16, %v106_v20  ;;  %v114_v29 = vmax.f32 %v112_v17, %v113_v21  ;;  %v265_v21 = vld [vmem:[#allocation8 + $0x20] sm:$0xff]  ;;  %s361_s12 = sshll.u32 %s591_s11, 4  ;;  %s362_s12 = int_to_ptr.vmem [resolvable:$true] %s361_s12 }
  0x40   :  { %vm147_vm4 = vcmask 1044484   ;;  %v94_v30 = vrot.slane %v93_v22, 2  ;;  %v101_v31 = vrot.slane %v100_v23, 2  ;;  %v120_v32 = vrot.slane %v119_v24, 4  ;;  %s551_s13 = scalar_lea.vmem %s362_s12, 128  ;;  %p556_p11 = scmp.lt.s32.totalorder %s362_s12, %s362_s12 }
  0x41   :  { %v127_v33 = vrot.slane %v126_v25, 4  ;;  %vm149_vm5 = vcmask 1045509   ;;  %v81_v34 = vmax.f32 %v79_v18, %v80_v26  ;;  %v88_v35 = vmax.f32 %v86_v19, %v87_v27  ;;  %v269_v27 = vld [vmem:[#allocation8 + $0x40] sm:$0xff]  ;;  %p552_p10 = scmp.ne.s32.totalorder %s362_s12, %s551_s13  ;;  %p557_p12 = scmp.lt.s32.totalorder %s551_s13, %s551_s13 }
  0x42   :  { %v108_v36 = vrot.slane %v107_v28, 2  ;;  %v115_v37 = vrot.slane %v114_v29, 2  ;;  %v95_v38 = vmax.f32 %v93_v22, %v94_v30  ;;  %v102_v39 = vmax.f32 %v100_v23, %v101_v31  ;;  %v266_v22 = vld [vmem:[#allocation8 + $0x28] sm:$0xff]  ;;  %v271_v30 = vld [vmem:[#allocation8 + $0x50] sm:$0xff]  ;;  %v272_v31 = vld [vmem:[#allocation8 + $0x58] sm:$0xff] }
  0x43   :  { %v121_v40 = vmax.f32 %v119_v24, %v120_v32  ;;  %v128_v41 = vmax.f32 %v126_v25, %v127_v33  ;;  %v82_v42 = vrot.slane %v81_v34, 1  ;;  %v89_v43 = vrot.slane %v88_v35, 1  ;;  %v267_v24 = vld [vmem:[#allocation8 + $0x30] sm:$0xff]  ;;  %v268_v25 = vld [vmem:[#allocation8 + $0x38] sm:$0xff]  ;;  %v273_v33 = vld [vmem:[#allocation8 + $0x60] sm:$0xff]  ;;  %p558_p13 = por %p557_p12, %p556_p11 }
  0x44   :  { %v109_v44 = vmax.f32 %v107_v28, %v108_v36  ;;  %v116_v45 = vmax.f32 %v114_v29, %v115_v37  ;;  %v96_v46 = vrot.slane %v95_v38, 1  ;;  %v103_v47 = vrot.slane %v102_v39, 1  ;;  %v270_v28 = vld [vmem:[#allocation8 + $0x48] sm:$0xff] }
  0x45   :  { %v122_v48 = vrot.slane %v121_v40, 2  ;;  %v129_v49 = vrot.slane %v128_v41, 2  ;;  %v83_v50 = vmax.f32 %v81_v34, %v82_v42  ;;  %v90_v51 = vmax.f32 %v88_v35, %v89_v43  ;;  %v274_v34 = vld [vmem:[#allocation8 + $0x68] sm:$0xff]  ;;  %v275_v42 = vld [vmem:[#allocation8 + $0x70] sm:$0xff]  ;;  %v276_v43 = vld [vmem:[#allocation8 + $0x78] sm:$0xff]  ;;  %p559_p0 = pnand %p558_p13, %p552_p10 }
  0x46   :  { %v110_v52 = vrot.slane %v109_v44, 1  ;;  %v117_v53 = vrot.slane %v116_v45, 1  ;;  %v97_v56 = vmax.f32 %v95_v38, %v96_v46  ;;  %v104_v57 = vmax.f32 %v102_v39, %v103_v47 }
  0x47   :  { %v123_v58 = vmax.f32 %v121_v40, %v122_v48  ;;  %v130_v59 = vmax.f32 %v128_v41, %v129_v49  ;;  %v142_v62 = vsel %vm141_vm1, %v90_v51, %v83_v50  ;;  %v586_v2 = vmov 0.0|0.0   ;;  %v373_v50 = vld [vmem:[%s703_s4] ss:$0 sm:$0xff] }
  0x48   :  { %v111_v60 = vmax.f32 %v109_v44, %v110_v52  ;;  %v118_v61 = vmax.f32 %v116_v45, %v117_v53  ;;  %v144_v1 = vsel %vm143_vm2, %v97_v56, %v142_v62  ;;  %442 = vmatprep.subr.bf16.mxu0 %v586_v2  ;;  %v443_v3 = vpack.c.bf16 %v176_v55, %v175_v54  ;;  %v371_v45 = vld [vmem:[%s701_s2] ss:$0 sm:$0xff] }
  0x49   :  { %v124_v63 = vrot.slane %v123_v58, 1  ;;  %v131_v0 = vrot.slane %v130_v59, 1  ;;  %448 = vmatprep.subr.bf16.mxu1 %v586_v2  ;;  %v146_v6 = vsel %vm145_vm3, %v104_v57, %v144_v1  ;;  %vm151_vm6 = vcmask 1046534  }
  0x4a   :  { %v148_v11 = vsel %vm147_vm4, %v111_v60, %v146_v6  ;;  %vm153_vm7 = vcmask 1047559   ;;  %444 = vmatpush3.bf16.msra.mxu0 %v443_v3  ;;  %vm587_vm8 = vmmov 0   ;;  %v588_v12 = vmov 0.0  }
  0x4b   :  { %v125_v9 = vmax.f32 %v123_v58, %v124_v63  ;;  %v132_v10 = vmax.f32 %v130_v59, %v131_v0  ;;  %404 = vmatprep.mubr.msk.f32.mxu0 %vm587_vm8, %v588_v12  ;;  %v150_v15 = vsel %vm149_vm5, %v118_v61, %v148_v11  ;;  %445 = vmatprep.subr.bf16.mxu0 %v586_v2  ;;  %vm186_vm9 = vcmask 261120  }
  0x4c   :  { %v446_v16 = vpack.c.bf16 %v178_v5, %v177_v4  ;;  %v449_v17 = vpack.c.bf16 %v262_v8, %v261_v7  ;;  %439 = vmatprep.mubr.msk.f32.mxu1 %vm587_vm8, %v588_v12  ;;  %v452_v20 = vpack.c.bf16 %v264_v14, %v263_v13  ;;  %v455_v23 = vpack.c.bf16 %v266_v22, %v265_v21 }
  0x4d   :  { %v152_v18 = vsel %vm151_vm6, %v125_v9, %v150_v15  ;;  %v458_v26 = vpack.c.bf16 %v268_v25, %v267_v24  ;;  %v461_v29 = vpack.c.bf16 %v270_v28, %v269_v27  ;;  %v464_v32 = vpack.c.bf16 %v272_v31, %v271_v30 }
  0x4e   :  { %v154_v19 = vsel %vm153_vm7, %v132_v10, %v152_v18  ;;  %450 = vmatpush3.bf16.msra.mxu1 %v449_v17  ;;  %447 = vmatpush3.bf16.msra.mxu0 %v446_v16  ;;  %v467_v35 = vpack.c.bf16 %v274_v34, %v273_v33  ;;  %v470_v44 = vpack.c.bf16 %v276_v43, %v275_v42 }
  0x4f   :  { %163 = vrot.lane.b32.xlu0 %v154_v19, %s589_s3  ;;  %171 = vrot.lane.b32.xlu1 %v154_v19, %s583_s1 }
  0x50   :  { %451 = vmatprep.subr.bf16.mxu1 %v586_v2 }
  0x52   :  { %453 = vmatpush3.bf16.msra.mxu1 %v452_v20 }
  0x53   :  { %167 = vrot.lane.b32.xlu0 %v154_v19, %s590_s28  ;;  %454 = vmatprep.subr.bf16.mxu1 %v586_v2 }
  0x56   :  { %456 = vmatpush3.bf16.msra.mxu1 %v455_v23 }
  0x57   :  { %457 = vmatprep.subr.bf16.mxu1 %v586_v2 }
  0x5a   :  { %459 = vmatpush3.bf16.msra.mxu1 %v458_v26 }
  0x5b   :  { %460 = vmatprep.subr.bf16.mxu1 %v586_v2 }
  0x5e   :  { %462 = vmatpush3.bf16.msra.mxu1 %v461_v29 }
  0x5f   :  { %463 = vmatprep.subr.bf16.mxu1 %v586_v2 }
  0x62   :  { %465 = vmatpush3.bf16.msra.mxu1 %v464_v32 }
  0x63   :  { %466 = vmatprep.subr.bf16.mxu1 %v586_v2 }
  0x66   :  { %468 = vmatpush3.bf16.msra.mxu1 %v467_v35 }
  0x67   :  { %469 = vmatprep.subr.bf16.mxu1 %v586_v2 }
  0x6a   :  { %471 = vmatpush3.bf16.msra.mxu1 %v470_v44 }
  0xc1   :  { %v164_v36 = vpop.permute.xlu0 %163  ;;  %v172_v39 = vpop.permute.xlu1 %171 }
  0xc2   :  { %v166_v37 = vmax.f32 %v154_v19, %v164_v36 }
  0xc5   :  { %v168_v38 = vpop.permute.xlu0 %167 }
  0xc6   :  { %v170_v40 = vmax.f32 %v166_v37, %v168_v38 }
  0xc8   :  { %v174_v41 = vmax.f32 %v170_v40, %v172_v39 }
  0xca   :  { %405 = vmatmul.mubr.msk.f32.vlgmr.msra.gmra.mrb[0].mxu0 %vm186_vm9, %v174_v41 }
 0x19d   :  { %v256_v46 = vpop.f32.mrb[0].mxu0 }
 0x19e   :  { %v257_v47 = vadd.f32 %v371_v45, %v256_v46  ;;  %v406_v48 = vpop.f32.mrb[1].mxu0 }
 0x1a0   :  { %v260_v49 = vmax.f32 %v257_v47, 0.0 }
 0x1a2   :  { %440 = vmatmul.mubr.f32.vlgmr.msra.gmra.mrb[0].mxu1 %v260_v49 }
 0x275   :  { %v350_v51 = vpop.f32.mrb[0].mxu1 }
 0x276   :  { %v351_v52 = vadd.f32 %v373_v50, %v350_v51  ;;  %v441_v53 = vpop.f32.mrb[1].mxu1 }
 0x278   :  { %354 = vst [vmem:[#allocation9] sm:$0xff] %v351_v52 }
 0x279   :  { %562 = shalt.err (!%p559_p0)
}
 0x27a   :  { %s563_s15 = scalar_lea.hbm %s704_s5, 128 }
 0x27b   :  { %p564_p1 = scmp.ne.s32.totalorder %s704_s5, %s563_s15  ;;  %p567_p2 = scmp.lt.u32.totalorder %s563_s15, %s704_s5 }
 0x27d   :  { %p569_p3 = pnand %p567_p2, %p564_p1 }
 0x27f   :  { %572 = shalt.err (!%p569_p3)
}
 0x280   :  { %364 = dma.vmem_to_hbm [thread:$0]  %s362_s12, 128, %s704_s5, [#allocation5]  }
 0x281   :  { %577 = dma.done.wait [#allocation5], 128  }
 0x282   :  { %578 = vsyncadd [#allocation5], 4294967168 }
 0x283   :  { %368 = vsyncpa [#allocation4], 1 }
 0x284   :  { %369 = vsyncpa [#allocation7], 1 }
 0x285   :  { %370 = vsyncpa [#allocation5], 1 }

</bundles_post_ra>
